<compile_context>
chip_gen: v5e
topology: v5e:2x2
jax: 0.10.0
libtpu: 0.0.40
codegen_flags: <defaults>
</compile_context>

<pallas_src>
import math

import jax
import jax.numpy as jnp
import numpy as np
from jax.experimental import pallas as pl
from jax.experimental.pallas import tpu as pltpu

_SQUARES = 64           # board squares summed by forward()
_LANES = 128            # batch (lane) axis padded to a multiple of the lane width
_MAX_BLOCK_COLS = 8192  # boards per grid step (64 * 8192 * 4 B = 2 MiB int32 per block)
_MIN_SPLIT_COLS = 4096  # above this, force >= 2 grid steps (v7x megacore sharding)
_SMALL_BATCH_N = 1024   # below this, a fused jnp where/sum beats a pallas_call dispatch


def _round_up(x, m):
    return ((x + m - 1) // m) * m


def _material_kernel(boards_ref, out_ref):
    """boards_ref: (64, TN) int in VMEM (squares on sublanes, boards on lanes);
    out_ref: (1, TN) int32 in VMEM (lane-dense)."""
    b = boards_ref[...].astype(jnp.int32)                       # widen in-kernel (int8 ok)
    sign = jnp.where(b >= 0, jnp.int32(1), jnp.int32(-1))
    # |b| <= 1 -> b itself (0 or +/-1); otherwise 3 * sign (faithful to the always-true
    # `abs(piece) == 2 or 3` branch of the reference; |4| / |5| branches are dead code).
    val = jnp.where(jnp.abs(b) <= 1, b, 3 * sign)
    # Sublane reduction over the 64 squares -> natively lane-dense (1, TN) row.
    out_ref[...] = jnp.sum(val, axis=0, keepdims=True)


def _eval_jnp(boards, axis):
    """Fused elementwise + reduce fallback for small batches (no Pallas dispatch)."""
    b = boards.astype(jnp.int32)
    sign = jnp.where(b >= 0, jnp.int32(1), jnp.int32(-1))
    val = jnp.where(jnp.abs(b) <= 1, b, 3 * sign)
    return jnp.sum(val, axis=axis).astype(jnp.int32)


def _pick_tiling(n):
    """Choose (grid_steps, boards_per_step, padded_n) with bounded padding."""
    g = max(1, math.ceil(n / _MAX_BLOCK_COLS))
    if g == 1 and n > _MIN_SPLIT_COLS:
        g = 2                       # let the "parallel" axis shard across 2 TCs on v7x
    tn = _round_up(math.ceil(n / g), _LANES)
    return g, tn, g * tn


def _eval_pallas_transposed(boards_t):
    """boards_t: (64, N) integer array, squares-major. Returns (N,) int32."""
    n = boards_t.shape[1]
    g, tn, n_pad = _pick_tiling(n)
    if n_pad != n:
        # Zero boards evaluate to 0; padded lanes are sliced away below.
        boards_t = jnp.pad(boards_t, ((0, 0), (0, n_pad - n)))

    out = pl.pallas_call(
        _material_kernel,
        out_shape=jax.ShapeDtypeStruct((1, n_pad), jnp.int32),
        grid=(g,),
        in_specs=[pl.BlockSpec((_SQUARES, tn), lambda i: (0, i))],
        out_specs=pl.BlockSpec((1, tn), lambda i: (0, i)),
        compiler_params=pltpu.CompilerParams(dimension_semantics=("parallel",)),
    )(boards_t)
    return out[0, :n]


def _as_int(boards):
    boards = jnp.asarray(boards)
    if not jnp.issubdtype(boards.dtype, jnp.integer):
        boards = boards.astype(jnp.int32)
    return boards


def base_model_eval_batch_transposed(boards_t, *, force_pallas=False):
    """boards_t: (>=64, N) integer array laid out squares-major (preferred, zero-copy
    layout -- no wrapper transpose needed). Returns (N,) int32 evaluations."""
    boards_t = _as_int(boards_t)
    if boards_t.ndim != 2 or boards_t.shape[0] < _SQUARES:
        raise ValueError(f"expected (>=64, N) squares-major boards, got {boards_t.shape}")
    boards_t = boards_t[:_SQUARES, :]
    n = boards_t.shape[1]
    if not force_pallas and n < _SMALL_BATCH_N:
        return _eval_jnp(boards_t, axis=0)
    return _eval_pallas_transposed(boards_t)


def base_model_eval_batch(boards, *, force_pallas=False):
    """boards: (N, >=64) integer array (boards-major). Returns (N,) int32 evaluations.
    Does one wrapper-side transpose to the squares-major layout the kernel wants;
    producers that can store boards as (64, N) should call
    base_model_eval_batch_transposed instead and skip that pass."""
    boards = _as_int(boards)
    if boards.ndim == 1:
        boards = boards[None, :]
    if boards.ndim != 2 or boards.shape[1] < _SQUARES:
        raise ValueError(f"expected (N, >=64) boards, got {boards.shape}")
    boards64 = boards[:, :_SQUARES]
    n = boards64.shape[0]
    if not force_pallas and n < _SMALL_BATCH_N:
        return _eval_jnp(boards64, axis=-1)
    return _eval_pallas_transposed(boards64.T)


def base_model_eval(board):
    """board: 1-D integer array of length >= 64. Returns int32 scalar evaluation
    (same signature/semantics as BaseModel.forward). Single boards use the fused-jnp
    path -- a pallas_call dispatch is pure overhead at this size."""
    return base_model_eval_batch(jnp.asarray(board)[None, :])[0]


def _reference_eval(board_np):
    """Pure-Python replica of the (buggy) numba forward for verification."""
    evaluation = 0
    for piece in np.asarray(board_np)[:_SQUARES]:
        piece = int(piece)
        colour_multiplier = 1 if piece >= 0 else -1
        if piece == 0:
            evaluation += 0
        elif abs(piece) == 1:
            evaluation += 1 * colour_multiplier
        elif abs(piece) == 2 or 3:   # always-true branch, as in the source
            evaluation += 3 * colour_multiplier
    return evaluation


if __name__ == "__main__":
    key = jax.random.PRNGKey(0)
    # A batch of 256 boards, each 64 squares with piece codes in [-5, 5] (0 = empty).
    boards = jax.random.randint(key, (256, 64), minval=-5, maxval=6, dtype=jnp.int32)

    boards_np = np.asarray(jax.device_get(boards))
    expected = np.array([_reference_eval(b) for b in boards_np], dtype=np.int32)

    # Pallas path, boards-major input (wrapper transposes once).
    got = np.asarray(jax.device_get(
        jax.block_until_ready(base_model_eval_batch(boards, force_pallas=True))))
    assert got.shape == expected.shape, (got.shape, expected.shape)
    assert np.array_equal(got, expected), f"pallas mismatch: {got[:8]} vs {expected[:8]}"

    # Pallas path, squares-major (pre-transposed) input -- the zero-copy layout.
    got_t = np.asarray(jax.device_get(
        jax.block_until_ready(
            base_model_eval_batch_transposed(boards.T, force_pallas=True))))
    assert np.array_equal(got_t, expected), "transposed-input pallas mismatch"

    # Pallas path with int8 boards (producer-side narrow storage).
    got_i8 = np.asarray(jax.device_get(
        jax.block_until_ready(
            base_model_eval_batch(boards.astype(jnp.int8), force_pallas=True))))
    assert np.array_equal(got_i8, expected), "int8 pallas mismatch"

    # Auto-dispatch (small batch -> fused jnp fast path).
    got_auto = np.asarray(jax.device_get(
        jax.block_until_ready(base_model_eval_batch(boards))))
    assert np.array_equal(got_auto, expected), "jnp fast-path mismatch"

    # Single-board path (the module's forward(board) signature).
    single = jax.block_until_ready(base_model_eval(boards[0]))
    assert int(single) == int(expected[0]), (int(single), int(expected[0]))

    print("KERNEL_OK")
</pallas_src>

<mosaic_0001>
module attributes {stable_mosaic.version = 11 : i64} {
  func.func @_material_kernel(%arg0: i32, %arg1: memref<64x256xi32, #tpu.memory_space<vmem>>, %arg2: memref<1x256xi32, #tpu.memory_space<vmem>>) attributes {dimension_semantics = [#tpu.dimension_semantics<parallel>], iteration_bounds = array<i64: 1>, scalar_prefetch = 0 : i64, scratch_operands = 0 : i64, tpu.core_type = #tpu.core_type<tc>, window_params = [{transform_indices = @transform_0, window_bounds = array<i64: 64, 256>}, {transform_indices = @transform_1, window_bounds = array<i64: 1, 256>}]} {
    %c0 = arith.constant 0 : index
    %c0_0 = arith.constant 0 : index
    %0 = vector.load %arg1[%c0, %c0_0] : memref<64x256xi32, #tpu.memory_space<vmem>>, vector<64x256xi32>
    %c0_i32 = arith.constant 0 : i32
    %1 = vector.broadcast %c0_i32 : i32 to vector<64x256xi32>
    %2 = arith.cmpi sge, %0, %1 : vector<64x256xi32>
    %c1_i32 = arith.constant 1 : i32
    %c-1_i32 = arith.constant -1 : i32
    %3 = vector.broadcast %c1_i32 : i32 to vector<64x256xi32>
    %4 = vector.broadcast %c-1_i32 : i32 to vector<64x256xi32>
    %5 = arith.select %2, %3, %4 : vector<64x256xi1>, vector<64x256xi32>
    %6 = math.absi %0 : vector<64x256xi32>
    %c1_i32_1 = arith.constant 1 : i32
    %7 = vector.broadcast %c1_i32_1 : i32 to vector<64x256xi32>
    %8 = arith.cmpi sle, %6, %7 : vector<64x256xi32>
    %c3_i32 = arith.constant 3 : i32
    %9 = vector.broadcast %c3_i32 : i32 to vector<64x256xi32>
    %10 = arith.muli %9, %5 : vector<64x256xi32>
    %11 = arith.select %8, %0, %10 : vector<64x256xi1>, vector<64x256xi32>
    %cst = arith.constant dense<0> : vector<256xi32>
    %12 = vector.multi_reduction <add>, %11, %cst [0] : vector<64x256xi32> to vector<256xi32>
    %13 = vector.shape_cast %12 : vector<256xi32> to vector<1x256xi32>
    %c0_2 = arith.constant 0 : index
    %c0_3 = arith.constant 0 : index
    %14 = vector.load %arg2[%c0_2, %c0_3] : memref<1x256xi32, #tpu.memory_space<vmem>>, vector<1x256xi32>
    tpu.vector_store %arg2[%c0_2, %c0_3], %13 {strides = array<i32>} : memref<1x256xi32, #tpu.memory_space<vmem>>, vector<1x256xi32>,
    return
  }
  func.func @transform_0(%arg0: i32) -> (i32, i32) {
    %c0_i32 = arith.constant 0 : i32
    %c0_i32_0 = arith.constant 0 : i32
    return %c0_i32, %arg0 : i32, i32
  }
  func.func @transform_1(%arg0: i32) -> (i32, i32) {
    %c0_i32 = arith.constant 0 : i32
    %c0_i32_0 = arith.constant 0 : i32
    return %c0_i32, %arg0 : i32, i32
  }
}

</mosaic_0001>

<bundles_post_ra>
// kernel: tpu_custom_call.1
= control target key start
LH: loop header
LB: loop body
LE: loop exit
PB: predicated region body
PF: predicated region fallthrough
CT: control target
= control target key end

     0   :  { %6 = vsyncpa [#allocation3], 0  ;;  %s526_s0 = inlined_call_operand.hbm [shape: s32[64,256], index: 0, kind: input, shape index: {}]   ;;  %s527_s1 = inlined_call_operand.hbm [shape: s32[1,256], index: 1, kind: output, shape index: {}]  }
   0x1   :  { %7 = vsyncpa [#allocation4], 0  ;;  %s12_s8 = sshll.u32 %s526_s0, 4  ;;  %s277_s9 = smov [#allocation2]   ;;  %s13_s8 = int_to_ptr.hbm [resolvable:$true] %s12_s8 }
   0x2   :  { %s14_s10 = sshll.u32 %s277_s9, 4  ;;  %s278_s11 = smov 256   ;;  %s15_s10 = int_to_ptr.vmem [resolvable:$true] %s14_s10 }
   0x3   :  { %s279_s12 = smov 16  }
   0x4   :  { %20 = dma.hbm_to_vmem [thread:$0]  %s13_s8, 2048, %s15_s10, [#allocation3], %s278_s11, %s278_s11, %s279_s12  }
   0x5   :  { %273 = dma.done.wait [#allocation3], 2048  }
   0x6   :  { %274 = vsyncadd [#allocation3], 4294965248  ;;  %v295_v0 = vld [vmem:[#allocation2] sm:$0xff]  ;;  %v297_v1 = vld [vmem:[#allocation2 + $0x8] sm:$0xff]  ;;  %v280_v16 = vmov 4294967295   ;;  %s281_s0 = smov [#allocation5]  }
   0x7   :  { %v299_v2 = vld [vmem:[#allocation2 + $0x10] sm:$0xff]  ;;  %v301_v3 = vld [vmem:[#allocation2 + $0x18] sm:$0xff]  ;;  %v303_v4 = vld [vmem:[#allocation2 + $0x20] sm:$0xff]  ;;  %vm41_vm0 = vcmp.ge.s32.totalorder %v295_v0, 0  ;;  %vm42_vm1 = vcmp.ge.s32.totalorder %v297_v1, 0  ;;  %v74_v31 = vsub.s32 0, %v295_v0 }
   0x8   :  { %v305_v5 = vld [vmem:[#allocation2 + $0x28] sm:$0xff]  ;;  %v307_v6 = vld [vmem:[#allocation2 + $0x30] sm:$0xff]  ;;  %v309_v7 = vld [vmem:[#allocation2 + $0x38] sm:$0xff]  ;;  %vm43_vm2 = vcmp.ge.s32.totalorder %v299_v2, 0  ;;  %vm44_vm3 = vcmp.ge.s32.totalorder %v301_v3, 0  ;;  %vm45_vm4 = vcmp.ge.s32.totalorder %v303_v4, 0 }
   0x9   :  { %v311_v8 = vld [vmem:[#allocation2 + $0x40] sm:$0xff]  ;;  %v315_v9 = vld [vmem:[#allocation2 + $0x48] sm:$0xff]  ;;  %v317_v10 = vld [vmem:[#allocation2 + $0x50] sm:$0xff]  ;;  %vm46_vm5 = vcmp.ge.s32.totalorder %v305_v5, 0  ;;  %vm47_vm6 = vcmp.ge.s32.totalorder %v307_v6, 0  ;;  %vm48_vm7 = vcmp.ge.s32.totalorder %v309_v7, 0 }
   0xa   :  { %v319_v11 = vld [vmem:[#allocation2 + $0x58] sm:$0xff]  ;;  %v324_v12 = vld [vmem:[#allocation2 + $0x60] sm:$0xff]  ;;  %v326_v13 = vld [vmem:[#allocation2 + $0x68] sm:$0xff]  ;;  %vm49_vm8 = vcmp.ge.s32.totalorder %v311_v8, 0  ;;  %vm50_vm9 = vcmp.ge.s32.totalorder %v315_v9, 0  ;;  %vm51_vm10 = vcmp.ge.s32.totalorder %v317_v10, 0 }
   0xb   :  { %v328_v14 = vld [vmem:[#allocation2 + $0x70] sm:$0xff]  ;;  %v333_v15 = vld [vmem:[#allocation2 + $0x78] sm:$0xff]  ;;  %vm52_vm11 = vcmp.ge.s32.totalorder %v319_v11, 0  ;;  %vm53_vm12 = vcmp.ge.s32.totalorder %v324_v12, 0  ;;  %vm54_vm13 = vcmp.ge.s32.totalorder %v326_v13, 0  ;;  %v344_v17 = vsel %vm41_vm0, 1, %v280_v16 }
   0xc   :  { %vm55_vm14 = vcmp.ge.s32.totalorder %v328_v14, 0  ;;  %vm56_vm15 = vcmp.ge.s32.totalorder %v333_v15, 0  ;;  %v349_v18 = vsel %vm42_vm1, 1, %v280_v16  ;;  %v353_v19 = vsel %vm43_vm2, 1, %v280_v16  ;;  %s208_s13 = sshll.u32 %s281_s0, 4  ;;  %s210_s16 = sshll.u32 %s527_s1, 4  ;;  %s209_s13 = int_to_ptr.vmem [resolvable:$true] %s208_s13  ;;  %s211_s16 = int_to_ptr.hbm [resolvable:$true] %s210_s16 }
   0xd   :  { %v357_v20 = vsel %vm44_vm3, 1, %v280_v16  ;;  %v361_v21 = vsel %vm45_vm4, 1, %v280_v16  ;;  %v365_v22 = vsel %vm46_vm5, 1, %v280_v16  ;;  %v369_v23 = vsel %vm47_vm6, 1, %v280_v16 }
   0xe   :  { %v373_v24 = vsel %vm48_vm7, 1, %v280_v16  ;;  %v377_v25 = vsel %vm49_vm8, 1, %v280_v16  ;;  %v381_v26 = vsel %vm50_vm9, 1, %v280_v16  ;;  %v385_v27 = vsel %vm51_vm10, 1, %v280_v16 }
   0xf   :  { %v389_v28 = vsel %vm52_vm11, 1, %v280_v16  ;;  %v393_v29 = vsel %vm53_vm12, 1, %v280_v16  ;;  %v397_v30 = vsel %vm54_vm13, 1, %v280_v16  ;;  %v77_v32 = vsub.s32 0, %v297_v1 }
  0x10   :  { %vm73_vm0 = vcmp.lt.s32.totalorder %v295_v0, 0  ;;  %vm76_vm1 = vcmp.lt.s32.totalorder %v297_v1, 0  ;;  %v80_v33 = vsub.s32 0, %v299_v2  ;;  %v83_v34 = vsub.s32 0, %v301_v3 }
  0x11   :  { %vm79_vm2 = vcmp.lt.s32.totalorder %v299_v2, 0  ;;  %vm82_vm3 = vcmp.lt.s32.totalorder %v301_v3, 0  ;;  %vm85_vm4 = vcmp.lt.s32.totalorder %v303_v4, 0  ;;  %v86_v35 = vsub.s32 0, %v303_v4 }
  0x12   :  { %v411_v36 = vsel %vm55_vm14, 1, %v280_v16  ;;  %v415_v37 = vsel %vm56_vm15, 1, %v280_v16  ;;  %vm88_vm5 = vcmp.lt.s32.totalorder %v305_v5, 0  ;;  %v89_v38 = vsub.s32 0, %v305_v5 }
  0x13   :  { %v420_v39 = vsel %vm73_vm0, %v74_v31, %v295_v0  ;;  %v423_v40 = vsel %vm76_vm1, %v77_v32, %v297_v1  ;;  %vm91_vm6 = vcmp.lt.s32.totalorder %v307_v6, 0  ;;  %v92_v41 = vsub.s32 0, %v307_v6 }
  0x14   :  { %v428_v42 = vsel %vm79_vm2, %v80_v33, %v299_v2  ;;  %v431_v43 = vsel %vm82_vm3, %v83_v34, %v301_v3  ;;  %v434_v44 = vsel %vm85_vm4, %v86_v35, %v303_v4  ;;  %v95_v45 = vsub.s32 0, %v309_v7 }
  0x15   :  { %v438_v46 = vsel %vm88_vm5, %v89_v38, %v305_v5  ;;  %vm94_vm7 = vcmp.lt.s32.totalorder %v309_v7, 0  ;;  %v98_v47 = vsub.s32 0, %v311_v8  ;;  %v101_v48 = vsub.s32 0, %v315_v9 }
  0x16   :  { %v93_v49 = vsel %vm91_vm6, %v92_v41, %v307_v6  ;;  %vm97_vm8 = vcmp.lt.s32.totalorder %v311_v8, 0  ;;  %vm100_vm9 = vcmp.lt.s32.totalorder %v315_v9, 0  ;;  %v104_v50 = vsub.s32 0, %v317_v10 }
  0x17   :  { %vm103_vm10 = vcmp.lt.s32.totalorder %v317_v10, 0  ;;  %vm106_vm11 = vcmp.lt.s32.totalorder %v319_v11, 0  ;;  %v107_v51 = vsub.s32 0, %v319_v11  ;;  %v110_v52 = vsub.s32 0, %v324_v12 }
  0x18   :  { %v96_v53 = vsel %vm94_vm7, %v95_v45, %v309_v7  ;;  %vm109_vm12 = vcmp.lt.s32.totalorder %v324_v12, 0  ;;  %vm112_vm13 = vcmp.lt.s32.totalorder %v326_v13, 0  ;;  %v113_v54 = vsub.s32 0, %v326_v13 }
  0x19   :  { %v99_v55 = vsel %vm97_vm8, %v98_v47, %v311_v8  ;;  %v102_v56 = vsel %vm100_vm9, %v101_v48, %v315_v9  ;;  %vm115_vm14 = vcmp.lt.s32.totalorder %v328_v14, 0  ;;  %v116_v57 = vsub.s32 0, %v328_v14 }
  0x1a   :  { %v105_v58 = vsel %vm103_vm10, %v104_v50, %v317_v10  ;;  %v108_v59 = vsel %vm106_vm11, %v107_v51, %v319_v11  ;;  %vm118_vm15 = vcmp.lt.s32.totalorder %v333_v15, 0  ;;  %v119_v60 = vsub.s32 0, %v333_v15 }
  0x1b   :  { %v111_v61 = vsel %vm109_vm12, %v110_v52, %v324_v12  ;;  %v114_v62 = vsel %vm112_vm13, %v113_v54, %v326_v13  ;;  %vm121_vm0 = vcmp.le.s32.totalorder %v420_v39, 1  ;;  %vm122_vm1 = vcmp.le.s32.totalorder %v423_v40, 1 }
  0x1c   :  { %v117_v63 = vsel %vm115_vm14, %v116_v57, %v328_v14  ;;  %vm123_vm2 = vcmp.le.s32.totalorder %v428_v42, 1  ;;  %vm124_vm3 = vcmp.le.s32.totalorder %v431_v43, 1  ;;  %vm125_vm4 = vcmp.le.s32.totalorder %v434_v44, 1 }
  0x1d   :  { %v120_v16 = vsel %vm118_vm15, %v119_v60, %v333_v15  ;;  %vm126_vm5 = vcmp.le.s32.totalorder %v438_v46, 1  ;;  %vm127_vm6 = vcmp.le.s32.totalorder %v93_v49, 1  ;;  %vm128_vm7 = vcmp.le.s32.totalorder %v96_v53, 1 }
  0x1e   :  { %vm129_vm8 = vcmp.le.s32.totalorder %v99_v55, 1  ;;  %vm130_vm9 = vcmp.le.s32.totalorder %v102_v56, 1  ;;  %vm131_vm10 = vcmp.le.s32.totalorder %v105_v58, 1  ;;  %vm132_vm11 = vcmp.le.s32.totalorder %v108_v59, 1 }
  0x1f   :  { %v137_v31 = vmul.u32 3, %v344_v17  ;;  %v138_v32 = vmul.u32 3, %v349_v18  ;;  %v139_v33 = vmul.u32 3, %v353_v19  ;;  %v140_v34 = vmul.u32 3, %v357_v20 }
  0x20   :  { %v141_v35 = vmul.u32 3, %v361_v21  ;;  %v142_v38 = vmul.u32 3, %v365_v22  ;;  %v143_v41 = vmul.u32 3, %v369_v23  ;;  %v144_v45 = vmul.u32 3, %v373_v24 }
  0x21   :  { %v145_v47 = vmul.u32 3, %v377_v25  ;;  %v146_v48 = vmul.u32 3, %v381_v26  ;;  %v147_v17 = vmul.u32 3, %v385_v27  ;;  %v148_v18 = vmul.u32 3, %v389_v28 }
  0x22   :  { %v149_v19 = vmul.u32 3, %v393_v29  ;;  %v150_v20 = vmul.u32 3, %v397_v30  ;;  %v151_v21 = vmul.u32 3, %v411_v36  ;;  %v152_v22 = vmul.u32 3, %v415_v37 }
  0x23   :  { %v153_v23 = vsel %vm121_vm0, %v295_v0, %v137_v31  ;;  %v154_v24 = vsel %vm122_vm1, %v297_v1, %v138_v32  ;;  %v155_v25 = vsel %vm123_vm2, %v299_v2, %v139_v33  ;;  %v156_v26 = vsel %vm124_vm3, %v301_v3, %v140_v34 }
  0x24   :  { %v157_v27 = vsel %vm125_vm4, %v303_v4, %v141_v35  ;;  %v158_v0 = vsel %vm126_vm5, %v305_v5, %v142_v38  ;;  %v159_v28 = vsel %vm127_vm6, %v307_v6, %v143_v41  ;;  %v160_v1 = vsel %vm128_vm7, %v309_v7, %v144_v45 }
  0x25   :  { %vm133_vm12 = vcmp.le.s32.totalorder %v111_v61, 1  ;;  %vm134_vm13 = vcmp.le.s32.totalorder %v114_v62, 1  ;;  %vm135_vm14 = vcmp.le.s32.totalorder %v117_v63, 1  ;;  %vm136_vm15 = vcmp.le.s32.totalorder %v120_v16, 1 }
  0x26   :  { %v161_v2 = vsel %vm129_vm8, %v311_v8, %v145_v47  ;;  %v162_v3 = vsel %vm130_vm9, %v315_v9, %v146_v48  ;;  %v163_v4 = vsel %vm131_vm10, %v317_v10, %v147_v17  ;;  %v164_v5 = vsel %vm132_vm11, %v319_v11, %v148_v18 }
  0x27   :  { %v169_v6 = vadd.s32 %v157_v27, %v153_v23  ;;  %v170_v29 = vadd.s32 %v159_v28, %v155_v25  ;;  %v182_v30 = vadd.s32 %v158_v0, %v154_v24  ;;  %v183_v7 = vadd.s32 %v160_v1, %v156_v26 }
  0x28   :  { %v165_v36 = vsel %vm133_vm12, %v324_v12, %v149_v19  ;;  %v166_v37 = vsel %vm134_vm13, %v326_v13, %v150_v20  ;;  %v167_v39 = vsel %vm135_vm14, %v328_v14, %v151_v21  ;;  %v168_v8 = vsel %vm136_vm15, %v333_v15, %v152_v22 }
  0x29   :  { %v171_v40 = vadd.s32 %v169_v6, %v161_v2  ;;  %v172_v9 = vadd.s32 %v170_v29, %v163_v4  ;;  %v184_v42 = vadd.s32 %v182_v30, %v162_v3  ;;  %v185_v43 = vadd.s32 %v183_v7, %v164_v5 }
  0x2a   :  { %v198_v57 = vlaneseq  ;;  %vm196_vm0 = vcmask 1040384  }
  0x2b   :  { %v173_v10 = vadd.s32 %v171_v40, %v165_v36  ;;  %v174_v44 = vadd.s32 %v172_v9, %v167_v39  ;;  %v186_v46 = vadd.s32 %v184_v42, %v166_v37  ;;  %v187_v11 = vadd.s32 %v185_v43, %v168_v8 }
  0x2c   :  { %vm200_vm1 = vcmp.lt.s32.totalorder %v198_v57, 256 }
  0x2d   :  { %v175_v49 = vadd.s32 %v174_v44, %v173_v10  ;;  %v188_v50 = vadd.s32 %v187_v11, %v186_v46 }
  0x2f   :  { %v176_v51 = vrot.slane %v175_v49, 4  ;;  %v189_v52 = vrot.slane %v188_v50, 4 }
  0x31   :  { %v177_v53 = vadd.s32 %v176_v51, %v175_v49  ;;  %v190_v12 = vadd.s32 %v189_v52, %v188_v50 }
  0x33   :  { %v178_v54 = vrot.slane %v177_v53, 2  ;;  %v191_v13 = vrot.slane %v190_v12, 2 }
  0x35   :  { %v179_v55 = vadd.s32 %v178_v54, %v177_v53  ;;  %v192_v14 = vadd.s32 %v191_v13, %v190_v12 }
  0x37   :  { %v180_v56 = vrot.slane %v179_v55, 1  ;;  %v193_v15 = vrot.slane %v192_v14, 1 }
  0x39   :  { %v181_v58 = vadd.s32 %v180_v56, %v179_v55  ;;  %v194_v59 = vadd.s32 %v193_v15, %v192_v14 }
  0x3b   :  { %v195_v60 = vrot.slane %v194_v59, 7 }
  0x3d   :  { %v197_v61 = vsel %vm196_vm0, %v181_v58, %v195_v60 }
  0x3e   :  { %202 = vst.msk [vmem:[#allocation5] sm:$0x3] %vm200_vm1, %v197_v61 }
  0x3f   :  { %213 = dma.vmem_to_hbm [thread:$0]  %s209_s13, 32, %s211_s16, [#allocation4]  }
  0x40   :  { %275 = dma.done.wait [#allocation4], 32  }
  0x41   :  { %276 = vsyncadd [#allocation4], 4294967264 }
  0x42   :  { %218 = vsyncpa [#allocation3], 1 }
  0x43   :  { %219 = vsyncpa [#allocation4], 1 }

</bundles_post_ra>
